<compile_context>
chip_gen: v5e
topology: v5e:2x2
jax: 0.10.0
libtpu: 0.0.40
codegen_flags: <defaults>
</compile_context>

<pallas_src>
import functools

import jax
import jax.numpy as jnp
from jax.experimental import pallas as pl
from jax.experimental.pallas import tpu as pltpu


LANES = 128
_MAX_TILE_TOKENS = 1024
_VMEM_HEADROOM = 8 * 1024 * 1024            # left for compiler internals
_DEFAULT_VMEM_CAPACITY = 64 * 1024 * 1024   # v7x per-TC (smallest generation)


def _round_up(x, m):
    return ((x + m - 1) // m) * m


def _round_down(x, m):
    return (x // m) * m


def _sublane_multiple(dtype):
    # Native sublane tile rows: f32 -> 8, bf16 -> 16, int8/fp8 -> 32.
    return max(8, 32 // jnp.dtype(dtype).itemsize)


def _device_vmem_capacity():
    """Per-core VMEM bytes (generation-aware); conservative fallback."""
    try:
        cap = int(getattr(pltpu.get_tpu_info(), "vmem_capacity_bytes", 0))
        if cap > 0:
            return cap
    except Exception:
        # Hardware query unavailable (e.g. interpret mode / AOT on CPU).
        pass
    return _DEFAULT_VMEM_CAPACITY


def _gating_kernel(x_ref, w_ref, o_ref):
    # x_ref: [tile_tokens, d_model]  VMEM tile (pipelined over the token grid)
    # w_ref: [d_model, e_pad]        grid-resident weight block
    # o_ref: [tile_tokens, e_pad]    lane-dense output tile
    o_ref[...] = jnp.dot(
        x_ref[...], w_ref[...], preferred_element_type=jnp.float32
    ).astype(o_ref.dtype)
    # TODO(synk): downstream per-token softmax / top-k could be fused here for
    # free (VPU/EUP idle under the x DMA), but ExpertGating.forward() only
    # returns the raw gating logits.


def prepare_gate_weight(weight, compute_dtype=None):
    """One-time prep of the nn.Linear weight [E, D] -> padded [D, E_pad].

    Do this at parameter init / load time (outside jit) so the forward never
    re-transposes, re-pads or re-casts the weight slab on every call.
    """
    e, d = weight.shape
    e_pad = _round_up(e, LANES)
    w_t = weight.T
    if compute_dtype is not None:
        w_t = w_t.astype(compute_dtype)
    if e_pad != e:
        w_t = jnp.pad(w_t, ((0, 0), (0, e_pad - e)))
    return w_t


def expert_gating_forward(x, w_prepared, num_experts, *,
                          tile_tokens=None, out_dtype=jnp.float32,
                          single_buffer_weight=True, x_buffer_count=2):
    """x: [B, S, D]; w_prepared: [D, E_pad] from prepare_gate_weight().

    Returns gating logits [B, S, num_experts] in `out_dtype` (f32 default so a
    bf16 input path still emits full-precision logits for softmax / top-k).
    """
    b, s, d = x.shape
    d_w, e_pad = w_prepared.shape
    if d != d_w:
        raise ValueError(f"d_model mismatch: x has {d}, prepared weight has {d_w}")
    if w_prepared.dtype != x.dtype:
        # Do NOT silently convert here: that would re-read/re-write the whole
        # weight slab from HBM on every forward call of a mem-bound kernel.
        raise ValueError(
            "w_prepared dtype must match x dtype; call "
            "prepare_gate_weight(weight, compute_dtype=x.dtype) once at load "
            f"time (got {w_prepared.dtype} vs {x.dtype}).")
    e = int(num_experts)
    if not (0 < e <= e_pad):
        raise ValueError(f"num_experts={e} incompatible with padded width {e_pad}")

    tokens = b * s
    x2d = x.reshape(tokens, d)                 # glue reshape (free)

    x_bytes = x2d.dtype.itemsize
    w_bytes = w_prepared.dtype.itemsize
    o_bytes = jnp.dtype(out_dtype).itemsize
    sub = _sublane_multiple(x2d.dtype)

    vmem_cap = _device_vmem_capacity()
    # Generation-aware tile budget: ~72 MiB on 128 MiB parts (v5e/v6e) keeps
    # tile_tokens at 512-1024 even for large-D f32; ~36 MiB on 64 MiB parts.
    target_vmem = (72 * 1024 * 1024 if vmem_cap >= 100 * 1024 * 1024
                   else 36 * 1024 * 1024)

    w_bufs = 1 if single_buffer_weight else 2
    x_bufs = max(2, int(x_buffer_count))
    out_bufs = 2
    per_row = x_bufs * d * x_bytes + out_bufs * e_pad * o_bytes
    fixed = w_bufs * d * e_pad * w_bytes

    if tile_tokens is None:
        budget = max(target_vmem - fixed, sub * per_row)
        tile_tokens = max(sub, _round_down(min(_MAX_TILE_TOKENS, budget // per_row), sub))
    tile_tokens = max(sub, _round_up(int(tile_tokens), sub))
    # Don't allocate more than one rounded tile's worth for tiny inputs.
    tile_tokens = min(tile_tokens, _round_up(tokens, sub))
    # Hard safety clamp: the whole working set must fit this generation's
    # per-core VMEM (minus headroom), whatever the caller requested.
    hard_budget = vmem_cap - 2 * _VMEM_HEADROOM
    max_tile = _round_down(max(hard_budget - fixed, sub * per_row) // per_row, sub)
    tile_tokens = int(max(sub, min(tile_tokens, max_tile)))

    # Ragged edge (tokens % tile != 0) is masked by Pallas on the output store
    # of the last block only -- no wrapper-side jnp.pad / row-slice copies.
    grid = (pl.cdiv(tokens, tile_tokens),)

    if single_buffer_weight:
        # Constant index_map -> a second weight buffer would be pure VMEM waste.
        w_spec = pl.BlockSpec((d, e_pad), lambda i: (0, 0),
                              pipeline_mode=pl.Buffered(1))
    else:
        w_spec = pl.BlockSpec((d, e_pad), lambda i: (0, 0))

    if x_bufs != 2:
        x_spec = pl.BlockSpec((tile_tokens, d), lambda i: (i, 0),
                              pipeline_mode=pl.Buffered(x_bufs))
    else:
        x_spec = pl.BlockSpec((tile_tokens, d), lambda i: (i, 0))

    vmem_need = (x_bufs * tile_tokens * d * x_bytes
                 + out_bufs * tile_tokens * e_pad * o_bytes
                 + w_bufs * d * e_pad * w_bytes)
    # Never request more than the physical per-core capacity minus headroom
    # (the old 96 MiB cap is illegal on v7x's 64 MiB VMEM).
    vmem_limit = int(min(max(32 * 1024 * 1024, vmem_need + _VMEM_HEADROOM),
                         vmem_cap - _VMEM_HEADROOM))

    cost = pl.CostEstimate(
        flops=2 * tokens * d * e_pad,
        transcendentals=0,
        bytes_accessed=(tokens * d * x_bytes          # x read (dominant)
                        + d * e_pad * w_bytes         # weight read (once)
                        + tokens * e_pad * o_bytes),  # logits write
    )

    out2d = pl.pallas_call(
        _gating_kernel,
        out_shape=jax.ShapeDtypeStruct((tokens, e_pad), out_dtype),
        grid_spec=pltpu.PrefetchScalarGridSpec(
            num_scalar_prefetch=0,
            grid=grid,
            in_specs=[x_spec, w_spec],
            out_specs=pl.BlockSpec((tile_tokens, e_pad), lambda i: (i, 0)),
        ),
        compiler_params=pltpu.CompilerParams(
            # 'parallel' lets the token grid shard across v7x's 2 TensorCores.
            dimension_semantics=("parallel",),
            vmem_limit_bytes=vmem_limit,
        ),
        cost_estimate=cost,
    )(x2d, w_prepared)

    if e != e_pad:
        out2d = out2d[:, :e]        # drop zero-padded expert columns
    return out2d.reshape(b, s, e)


def make_expert_gating_params(key, d_model, num_experts, dtype=jnp.float32):
    """Deterministic init matching nn.init.normal_(std=0.02); bias=False."""
    w = jax.random.normal(key, (num_experts, d_model), dtype=dtype) * 0.02
    return {"weight": w}


if __name__ == "__main__":
    # Small shapes consistent with the module's forward signature.
    batch, seq, d_model, num_experts = 2, 8, 32, 8

    key = jax.random.PRNGKey(0)
    k_x, k_w = jax.random.split(key)

    x = jax.random.normal(k_x, (batch, seq, d_model), dtype=jnp.float32)
    params = make_expert_gating_params(k_w, d_model, num_experts)

    # One-time weight prep (transpose + pad E to 128 lanes), outside jit.
    w_f32 = prepare_gate_weight(params["weight"])

    def run(x_in, w_prepared, single_buffer_weight):
        fwd = jax.jit(functools.partial(
            expert_gating_forward,
            num_experts=num_experts,
            single_buffer_weight=single_buffer_weight))
        return jax.block_until_ready(fwd(x_in, w_prepared))

    # Prefer the single-buffered resident weight block (saves one [D, E_pad]
    # VMEM copy -- matters on v7x).  Fall back to the default double-buffered
    # spec only on lowering / construction errors from pipeline_mode=Buffered(1);
    # numerics are independently verified against the reference below.
    try:
        logits = run(x, w_f32, True)
        sbw = True
    except (pltpu.LoweringException, NotImplementedError, ValueError, TypeError):
        logits = run(x, w_f32, False)
        sbw = False

    # Reference check against plain JAX einsum (f32 logits).
    ref = jnp.einsum("bsd,ed->bse", x, params["weight"])
    assert logits.shape == (batch, seq, num_experts)
    assert logits.dtype == jnp.float32
    assert jnp.allclose(logits, ref, atol=1e-5, rtol=1e-5)

    # Ragged token count (B*S not a tile multiple) exercises the in-kernel
    # edge-block masking that replaced the wrapper-side jnp.pad.
    x_odd = x[:, : seq - 1, :]
    logits_odd = run(x_odd, w_f32, sbw)
    ref_odd = jnp.einsum("bsd,ed->bse", x_odd, params["weight"])
    assert logits_odd.shape == (batch, seq - 1, num_experts)
    assert jnp.allclose(logits_odd, ref_odd, atol=1e-5, rtol=1e-5)

    # bf16 input path (halves the HBM bytes of x); logits still emitted in f32.
    x_bf16 = x.astype(jnp.bfloat16)
    w_bf16 = prepare_gate_weight(params["weight"], compute_dtype=jnp.bfloat16)
    logits_bf16 = run(x_bf16, w_bf16, sbw)
    assert logits_bf16.dtype == jnp.float32
    assert jnp.allclose(logits_bf16, ref, atol=2e-2, rtol=2e-2)

    # TODO(synk): add_noise() (training-time jitter) is not part of forward();
    # it could be fused via pltpu.prng_seed + pltpu.stateful_normal if needed.
    print("KERNEL_OK")
</pallas_src>

<mosaic_0001>
module attributes {stable_mosaic.version = 11 : i64} {
  func.func @_gating_kernel(%arg0: i32, %arg1: memref<16x32xf32, #tpu.memory_space<vmem>>, %arg2: memref<32x128xf32, #tpu.memory_space<vmem>>, %arg3: memref<16x128xf32, #tpu.memory_space<vmem>>) attributes {dimension_semantics = [#tpu.dimension_semantics<parallel>], iteration_bounds = array<i64: 1>, scalar_prefetch = 0 : i64, scratch_operands = 0 : i64, tpu.core_type = #tpu.core_type<tc>, window_params = [{transform_indices = @transform_0, window_bounds = array<i64: 16, 32>}, {pipeline_mode = #tpu.pipeline_mode<synchronous>, transform_indices = @transform_1, window_bounds = array<i64: 32, 128>}, {transform_indices = @transform_2, window_bounds = array<i64: 16, 128>}]} {
    %c0 = arith.constant 0 : index
    %c0_0 = arith.constant 0 : index
    %0 = vector.load %arg1[%c0, %c0_0] : memref<16x32xf32, #tpu.memory_space<vmem>>, vector<16x32xf32>
    %c0_1 = arith.constant 0 : index
    %c0_2 = arith.constant 0 : index
    %1 = vector.load %arg2[%c0_1, %c0_2] : memref<32x128xf32, #tpu.memory_space<vmem>>, vector<32x128xf32>
    %cst = arith.constant dense<0.000000e+00> : vector<16x128xf32>
    %2 = tpu.matmul %0, %1, %cst {dimension_numbers = #tpu.dot_dimension_numbers<[1], [0], [0], [1], [0, 0, 1, 1], [], []>} : vector<16x32xf32>, vector<32x128xf32>, vector<16x128xf32> -> vector<16x128xf32>
    %c0_3 = arith.constant 0 : index
    %c0_4 = arith.constant 0 : index
    %3 = vector.load %arg3[%c0_3, %c0_4] : memref<16x128xf32, #tpu.memory_space<vmem>>, vector<16x128xf32>
    tpu.vector_store %arg3[%c0_3, %c0_4], %2 {strides = array<i32>} : memref<16x128xf32, #tpu.memory_space<vmem>>, vector<16x128xf32>,
    return
  }
  func.func @transform_0(%arg0: i32) -> (i32, i32) {
    %c0_i32 = arith.constant 0 : i32
    %c0_i32_0 = arith.constant 0 : i32
    return %arg0, %c0_i32 : i32, i32
  }
  func.func @transform_1(%arg0: i32) -> (i32, i32) {
    %c0_i32 = arith.constant 0 : i32
    %c0_i32_0 = arith.constant 0 : i32
    %c0_i32_1 = arith.constant 0 : i32
    return %c0_i32, %c0_i32_0 : i32, i32
  }
  func.func @transform_2(%arg0: i32) -> (i32, i32) {
    %c0_i32 = arith.constant 0 : i32
    %c0_i32_0 = arith.constant 0 : i32
    return %arg0, %c0_i32 : i32, i32
  }
}

</mosaic_0001>

<bundles_post_ra>
// kernel: expert_gating_forward.1
= control target key start
LH: loop header
LB: loop body
LE: loop exit
PB: predicated region body
PF: predicated region fallthrough
CT: control target
= control target key end

     0   :  { %7 = vsyncpa [#allocation3], 0  ;;  %s180_s0 = inlined_call_operand.hbm [shape: f32[16,32], index: 0, kind: input, shape index: {}]   ;;  %s181_s1 = inlined_call_operand.hbm [shape: f32[32,128], index: 1, kind: input, shape index: {}]   ;;  %s182_s2 = inlined_call_operand.vmem [shape: f32[16,128], index: 2, kind: output, shape index: {}]  }
   0x1   :  { %s13_s11 = sshll.u32 %s180_s0, 4  ;;  %s14_s11 = int_to_ptr.hbm [resolvable:$true] %s13_s11 }
   0x2   :  { %8 = vsyncpa [#allocation5], 0  ;;  %s149_s12 = smov [#allocation2]   ;;  %s26_s16 = sshll.u32 %s181_s1, 4  ;;  %s27_s16 = int_to_ptr.hbm [resolvable:$true] %s26_s16 }
   0x3   :  { %s15_s13 = sshll.u32 %s149_s12, 4  ;;  %s150_s17 = smov 128   ;;  %s16_s13 = int_to_ptr.vmem [resolvable:$true] %s15_s13 }
   0x4   :  { %s151_s18 = smov 8   ;;  %s152_s19 = smov [#allocation4]  }
   0x5   :  { %21 = dma.hbm_to_vmem [thread:$0]  %s14_s11, 256, %s16_s13, [#allocation3], %s150_s17, %s150_s17, %s151_s18  }
   0x6   :  { %s28_s20 = sshll.u32 %s152_s19, 4  ;;  %s29_s20 = int_to_ptr.vmem [resolvable:$true] %s28_s20 }
   0x7   :  { %34 = dma.hbm_to_vmem [thread:$0]  %s27_s16, 512, %s29_s20, [#allocation5], %s150_s17, %s150_s17, %s151_s18  }
   0x8   :  { %145 = dma.done.wait [#allocation3], 256  }
   0x9   :  { %146 = vsyncadd [#allocation3], 4294967040 }
   0xa   :  { %147 = dma.done.wait [#allocation5], 512  }
   0xb   :  { %148 = vsyncadd [#allocation5], 4294966784  ;;  %v48_v0 = vld [vmem:[#allocation4 + $0x18] sm:$0xff]  ;;  %v47_v1 = vld [vmem:[#allocation4 + $0x10] sm:$0xff]  ;;  %vm49_vm0 = vcmask 261120  }
   0xc   :  { %68 = vmatpush.msra.mxu0 %v48_v0  ;;  %89 = vmatpush.msra.mxu1 %v48_v0  ;;  %v46_v2 = vld [vmem:[#allocation4 + $0x8] sm:$0xff]  ;;  %v45_v3 = vld [vmem:[#allocation4] sm:$0xff]  ;;  %v43_v4 = vld [vmem:[#allocation2] sm:$0xff] }
   0xd   :  { %v44_v5 = vld [vmem:[#allocation2 + $0x8] sm:$0xff] }
   0xe   :  { %69 = vmatpush.msra.mxu0 %v47_v1  ;;  %90 = vmatpush.msra.mxu1 %v47_v1 }
  0x10   :  { %70 = vmatpush.msra.mxu0 %v46_v2  ;;  %91 = vmatpush.msra.mxu1 %v46_v2 }
  0x12   :  { %71 = vmatpush.msra.mxu0 %v45_v3  ;;  %92 = vmatpush.msra.mxu1 %v45_v3 }
  0x13   :  { %87 = vmatmul.msk.f32.vlgmr.msra.gmra.mxu0 %vm49_vm0, %v43_v4  ;;  %88 = vmatmul.msk.f32.vlgmr.msra.gmra.mxu1 %vm49_vm0, %v44_v5 }
  0x90   :  { %v73_v6 = vpop.f32.mrf.mxu0  ;;  %v76_v7 = vpop.f32.mrf.mxu1 }
  0x91   :  { %79 = vst [vmem:[%s182_s2] sm:$0xff] %v73_v6 }
  0x92   :  { %80 = vst [vmem:[%s182_s2 + $0x8] sm:$0xff] %v76_v7 }
  0x93   :  { %85 = vsyncpa [#allocation3], 1 }
  0x94   :  { %86 = vsyncpa [#allocation5], 1 }

</bundles_post_ra>
